<compile_context>
chip_gen: v7x
topology: tpu7x:2x2x1
jax: 0.10.0
libtpu: 0.0.40
codegen_flags: <defaults>
</compile_context>

<pallas_src>
import jax
import jax.numpy as jnp
from jax.experimental import pallas as pl
from jax.experimental.pallas import tpu as pltpu

BN_EPS = 1e-5  # nn.BatchNorm2d default


def _round_up(x, m):
    return (x + m - 1) // m * m


def conv_stats_kernel(p_ref, w_ref, y_ref, stats_ref):
    """One M-tile of the conv GEMM plus per-tile BN partial statistics.

    p_ref:     (TM, Kp)  matmul dtype (bf16 by default)
    w_ref:     (Kp, Cp)  matmul dtype, resident across all M-tiles
    y_ref:     (TM, Cp)  f32 pre-norm conv output (input of phase 2)
    stats_ref: (8, Cp)   f32; row 0 = sum_m y, row 1 = sum_m y*y, rows 2..7 zero
    """
    y = jnp.dot(p_ref[...], w_ref[...], preferred_element_type=jnp.float32)
    y_ref[...] = y
    s = jnp.sum(y, axis=0, keepdims=True)          # (1, Cp)
    sq = jnp.sum(y * y, axis=0, keepdims=True)     # (1, Cp)
    stats_ref[0:1, :] = s
    stats_ref[1:2, :] = sq
    stats_ref[2:8, :] = jnp.zeros((6, s.shape[1]), jnp.float32)


def bn_apply_kernel(y_ref, scale_ref, shift_ref, o_ref):
    """out = y * scale + shift; scale/shift fold gamma, beta, mean, inv_std."""
    o_ref[...] = (y_ref[...] * scale_ref[...] + shift_ref[...]).astype(o_ref.dtype)


def im2col(x, k, stride, pad):
    """x: (N, C, H, W) NCHW -> patches (N*Hout*Wout, C*k*k), plus (Hout, Wout)."""
    N, C, H, W = x.shape
    Hout = (H + 2 * pad - k) // stride + 1
    Wout = (W + 2 * pad - k) // stride + 1
    xp = jnp.pad(x, ((0, 0), (0, 0), (pad, pad), (pad, pad)))
    cols = []
    for dy in range(k):
        for dx in range(k):
            cols.append(
                xp[:, :, dy:dy + (Hout - 1) * stride + 1:stride,
                         dx:dx + (Wout - 1) * stride + 1:stride])
    # (N, C, k*k, Hout, Wout) with (C, kh, kw) flattening order matching PyTorch weight
    p = jnp.stack(cols, axis=2)
    p = p.transpose(0, 3, 4, 1, 2).reshape(N * Hout * Wout, C * k * k)
    return p, Hout, Wout


def conv_norm_layer_forward(x, weight, gamma, beta, *, stride=1, padding=None,
                            tm=512, matmul_dtype=jnp.bfloat16):
    """ConvNormLayer.forward (norm_layer='bn', bias=False, act=None, mask=None).

    x:      (N, C_in, H, W)   float32, NCHW (PyTorch convention)
    weight: (C_out, C_in, k, k)
    gamma/beta: (C_out,)      BatchNorm2d affine params
    returns (N, C_out, H_out, W_out) float32
    """
    N, Cin, H, W = x.shape
    Cout, _, k, _ = weight.shape
    pad = (k - 1) // 2 if padding is None else padding

    patches, Hout, Wout = im2col(x, k, stride, pad)            # (M, K) f32
    M, K = patches.shape

    # Lane/sublane friendly padding.
    Kp = _round_up(K, 128)
    Cp = _round_up(Cout, 128)
    tm = _round_up(min(tm, M), 8)
    Mp = _round_up(M, tm)
    num_tiles = Mp // tm

    patches_p = jnp.zeros((Mp, Kp), matmul_dtype).at[:M, :K].set(
        patches.astype(matmul_dtype))
    w_flat = weight.reshape(Cout, Cin * k * k).T                # (K, Cout)
    w_p = jnp.zeros((Kp, Cp), matmul_dtype).at[:K, :Cout].set(
        w_flat.astype(matmul_dtype))

    # ---- Phase 1: tiled conv GEMM + per-tile channel sum / sum-of-squares ----
    y, stats = pl.pallas_call(
        conv_stats_kernel,
        out_shape=(jax.ShapeDtypeStruct((Mp, Cp), jnp.float32),
                   jax.ShapeDtypeStruct((num_tiles * 8, Cp), jnp.float32)),
        grid=(num_tiles,),
        in_specs=[
            pl.BlockSpec((tm, Kp), lambda i: (i, 0)),
            pl.BlockSpec((Kp, Cp), lambda i: (0, 0)),   # weights resident across tiles
        ],
        out_specs=(pl.BlockSpec((tm, Cp), lambda i: (i, 0)),
                   pl.BlockSpec((8, Cp), lambda i: (i, 0))),
        compiler_params=pltpu.CompilerParams(
            dimension_semantics=("parallel",),          # shard M-tiles across TCs (v7x)
            vmem_limit_bytes=32 << 20),
    )(patches_p, w_p)

    # ---- BatchNorm2d (training-mode, biased) stats finalize: tiny (Cp,) math ----
    # Zero-padded rows/channels contribute exactly 0 to both accumulators.
    stats = stats.reshape(num_tiles, 8, Cp)
    total = jnp.sum(stats[:, 0, :], axis=0)             # sum_m y
    total_sq = jnp.sum(stats[:, 1, :], axis=0)           # sum_m y^2
    inv_m = 1.0 / float(M)
    mean = total * inv_m
    var = total_sq * inv_m - mean * mean
    inv_std = jax.lax.rsqrt(var + BN_EPS)
    gamma_p = jnp.zeros((Cp,), jnp.float32).at[:Cout].set(gamma.astype(jnp.float32))
    beta_p = jnp.zeros((Cp,), jnp.float32).at[:Cout].set(beta.astype(jnp.float32))
    scale = (gamma_p * inv_std).reshape(1, Cp)
    shift = (beta_p - mean * gamma_p * inv_std).reshape(1, Cp)

    # ---- Phase 2: tiled normalize (single multiply-add per element) ----
    out2d = pl.pallas_call(
        bn_apply_kernel,
        out_shape=jax.ShapeDtypeStruct((Mp, Cp), jnp.float32),
        grid=(num_tiles,),
        in_specs=[
            pl.BlockSpec((tm, Cp), lambda i: (i, 0)),
            pl.BlockSpec((1, Cp), lambda i: (0, 0)),
            pl.BlockSpec((1, Cp), lambda i: (0, 0)),
        ],
        out_specs=pl.BlockSpec((tm, Cp), lambda i: (i, 0)),
        compiler_params=pltpu.CompilerParams(
            dimension_semantics=("parallel",),
            vmem_limit_bytes=32 << 20),
    )(y, scale, shift)

    # Glue back to the module's NCHW output layout (act = Identity; mask path unused).
    return out2d[:M, :Cout].reshape(N, Hout, Wout, Cout).transpose(0, 3, 1, 2)


def reference_forward(x, weight, gamma, beta, *, stride=1, padding=None):
    """Pure-JAX reference: conv2d + BatchNorm2d (batch stats) + identity."""
    Cout, Cin, k, _ = weight.shape
    pad = (k - 1) // 2 if padding is None else padding
    y = jax.lax.conv_general_dilated(
        x, weight, window_strides=(stride, stride),
        padding=[(pad, pad), (pad, pad)],
        dimension_numbers=("NCHW", "OIHW", "NCHW"))
    mean = jnp.mean(y, axis=(0, 2, 3), keepdims=True)
    var = jnp.mean((y - mean) ** 2, axis=(0, 2, 3), keepdims=True)
    yhat = (y - mean) * jax.lax.rsqrt(var + BN_EPS)
    return yhat * gamma.reshape(1, -1, 1, 1) + beta.reshape(1, -1, 1, 1)


if __name__ == "__main__":
    key = jax.random.PRNGKey(0)
    k_x, k_w, k_g, k_b = jax.random.split(key, 4)

    # ConvNormLayer(ch_in=4, ch_out=8, kernel_size=3, stride=1) -> bn, no bias, identity act
    N, Cin, H, W = 2, 4, 16, 16
    Cout, ksz, stride = 8, 3, 1

    x = jax.random.normal(k_x, (N, Cin, H, W), dtype=jnp.float32)
    weight = jax.random.normal(k_w, (Cout, Cin, ksz, ksz), dtype=jnp.float32) * 0.1
    gamma = 1.0 + 0.1 * jax.random.normal(k_g, (Cout,), dtype=jnp.float32)
    beta = 0.1 * jax.random.normal(k_b, (Cout,), dtype=jnp.float32)

    ref = reference_forward(x, weight, gamma, beta, stride=stride)

    # Exercise the multi-tile grid (M = 512 rows -> 4 tiles of 128).
    # f32 matmul path: tight tolerance vs the f32 reference.
    out_f32 = conv_norm_layer_forward(
        x, weight, gamma, beta, stride=stride, tm=128, matmul_dtype=jnp.float32)
    out_f32 = jax.block_until_ready(out_f32)
    assert out_f32.shape == (N, Cout, H, W), out_f32.shape
    assert jnp.allclose(out_f32, ref, atol=2e-4, rtol=2e-4), \
        float(jnp.max(jnp.abs(out_f32 - ref)))

    # Default bf16 matmul path (fast MXU path on v6e/v7x): looser tolerance.
    out_bf16 = conv_norm_layer_forward(
        x, weight, gamma, beta, stride=stride, tm=128, matmul_dtype=jnp.bfloat16)
    out_bf16 = jax.block_until_ready(out_bf16)
    assert out_bf16.shape == (N, Cout, H, W), out_bf16.shape
    assert jnp.allclose(out_bf16, ref, atol=3e-2, rtol=3e-2), \
        float(jnp.max(jnp.abs(out_bf16 - ref)))

    print("KERNEL_OK")
</pallas_src>

<mosaic_0001>
module attributes {stable_mosaic.version = 11 : i64} {
  func.func @conv_stats_kernel(%arg0: i32, %arg1: memref<128x128xf32, #tpu.memory_space<vmem>>, %arg2: memref<128x128xf32, #tpu.memory_space<vmem>>, %arg3: memref<128x128xf32, #tpu.memory_space<vmem>>, %arg4: memref<8x128xf32, #tpu.memory_space<vmem>>) attributes {dimension_semantics = [#tpu.dimension_semantics<parallel>], iteration_bounds = array<i64: 4>, scalar_prefetch = 0 : i64, scratch_operands = 0 : i64, tpu.core_type = #tpu.core_type<tc>, window_params = [{transform_indices = @transform_0, window_bounds = array<i64: 128, 128>}, {pipeline_mode = #tpu.pipeline_mode<synchronous>, transform_indices = @transform_1, window_bounds = array<i64: 128, 128>}, {transform_indices = @transform_2, window_bounds = array<i64: 128, 128>}, {transform_indices = @transform_3, window_bounds = array<i64: 8, 128>}]} {
    %c0 = arith.constant 0 : index
    %c0_0 = arith.constant 0 : index
    %0 = vector.load %arg1[%c0, %c0_0] : memref<128x128xf32, #tpu.memory_space<vmem>>, vector<128x128xf32>
    %c0_1 = arith.constant 0 : index
    %c0_2 = arith.constant 0 : index
    %1 = vector.load %arg2[%c0_1, %c0_2] : memref<128x128xf32, #tpu.memory_space<vmem>>, vector<128x128xf32>
    %cst = arith.constant dense<0.000000e+00> : vector<128x128xf32>
    %2 = tpu.matmul %0, %1, %cst {dimension_numbers = #tpu.dot_dimension_numbers<[1], [0], [0], [1], [0, 0, 1, 1], [], []>} : vector<128x128xf32>, vector<128x128xf32>, vector<128x128xf32> -> vector<128x128xf32>
    %c0_3 = arith.constant 0 : index
    %c0_4 = arith.constant 0 : index
    %3 = vector.load %arg3[%c0_3, %c0_4] : memref<128x128xf32, #tpu.memory_space<vmem>>, vector<128x128xf32>
    tpu.vector_store %arg3[%c0_3, %c0_4], %2 {strides = array<i32>} : memref<128x128xf32, #tpu.memory_space<vmem>>, vector<128x128xf32>,
    %cst_5 = arith.constant dense<0.000000e+00> : vector<128xf32>
    %4 = vector.multi_reduction <add>, %2, %cst_5 [0] : vector<128x128xf32> to vector<128xf32>
    %5 = vector.shape_cast %4 : vector<128xf32> to vector<1x128xf32>
    %6 = arith.mulf %2, %2 : vector<128x128xf32>
    %cst_6 = arith.constant dense<0.000000e+00> : vector<128xf32>
    %7 = vector.multi_reduction <add>, %6, %cst_6 [0] : vector<128x128xf32> to vector<128xf32>
    %8 = vector.shape_cast %7 : vector<128xf32> to vector<1x128xf32>
    %c0_7 = arith.constant 0 : index
    %c0_8 = arith.constant 0 : index
    %9 = vector.load %arg4[%c0_7, %c0_8] : memref<8x128xf32, #tpu.memory_space<vmem>>, vector<1x128xf32>
    tpu.vector_store %arg4[%c0_7, %c0_8], %5 {strides = array<i32>} : memref<8x128xf32, #tpu.memory_space<vmem>>, vector<1x128xf32>,
    %c1 = arith.constant 1 : index
    %c0_9 = arith.constant 0 : index
    %10 = vector.load %arg4[%c1, %c0_9] : memref<8x128xf32, #tpu.memory_space<vmem>>, vector<1x128xf32>
    tpu.vector_store %arg4[%c1, %c0_9], %8 {strides = array<i32>} : memref<8x128xf32, #tpu.memory_space<vmem>>, vector<1x128xf32>,
    %cst_10 = arith.constant 0.000000e+00 : f32
    %11 = vector.broadcast %cst_10 : f32 to vector<6x128xf32>
    %c2 = arith.constant 2 : index
    %c0_11 = arith.constant 0 : index
    %12 = vector.load %arg4[%c2, %c0_11] : memref<8x128xf32, #tpu.memory_space<vmem>>, vector<6x128xf32>
    tpu.vector_store %arg4[%c2, %c0_11], %11 {strides = array<i32>} : memref<8x128xf32, #tpu.memory_space<vmem>>, vector<6x128xf32>,
    return
  }
  func.func @transform_0(%arg0: i32) -> (i32, i32) {
    %c0_i32 = arith.constant 0 : i32
    %c0_i32_0 = arith.constant 0 : i32
    return %arg0, %c0_i32 : i32, i32
  }
  func.func @transform_1(%arg0: i32) -> (i32, i32) {
    %c0_i32 = arith.constant 0 : i32
    %c0_i32_0 = arith.constant 0 : i32
    %c0_i32_1 = arith.constant 0 : i32
    return %c0_i32, %c0_i32_0 : i32, i32
  }
  func.func @transform_2(%arg0: i32) -> (i32, i32) {
    %c0_i32 = arith.constant 0 : i32
    %c0_i32_0 = arith.constant 0 : i32
    return %arg0, %c0_i32 : i32, i32
  }
  func.func @transform_3(%arg0: i32) -> (i32, i32) {
    %c0_i32 = arith.constant 0 : i32
    %c0_i32_0 = arith.constant 0 : i32
    return %arg0, %c0_i32 : i32, i32
  }
}

</mosaic_0001>

<bundles_post_ra>
// kernel: tpu_custom_call.1
= control target key start
LH: loop header
LB: loop body
LE: loop exit
PB: predicated region body
PF: predicated region fallthrough
CT: control target
= control target key end

     0   :  { %9 = vsyncpa [#allocation3], 0  ;;  %s1351_s0 = inlined_call_operand.hbm [shape: f32[512,128], index: 0, kind: input, shape index: {}]   ;;  %s1352_s1 = inlined_call_operand.hbm [shape: f32[128,128], index: 1, kind: input, shape index: {}]   ;;  %s1353_s2 = inlined_call_operand.hbm [shape: f32[512,128], index: 2, kind: output, shape index: {0}]   ;;  %s1354_s3 = inlined_call_operand.hbm [shape: f32[32,128], index: 3, kind: output, shape index: {1}]  }
   0x1   :  { %11 = vsyncpa [#allocation3 + $0x1], 0 }
   0x2   :  { %12 = vsyncpa [#allocation6], 0 }
   0x3   :  { %13 = vsyncpa [#allocation4], 0 }
   0x4   :  { %15 = vsyncpa [#allocation4 + $0x1], 0 }
   0x5   :  { %16 = vsyncpa [#allocation9], 0 }
   0x6   :  { %18 = vsyncpa [#allocation9 + $0x1], 0  ;;  %s1033_s12 = smov 0   ;;  %s1035_s13 = smov 0  }
   0x7   :  { %s1037_s14 = smov 0   ;;  %s1039_s15 = smov 0  }
   0x8 LB: > { %s1054_s16 = sadd.s32 4294967295, %s1002_s15   ;;  %s618_s17 = sadd.s32 4294967294, %s1002_s15   ;;  %s1002_s15 = sphi %s1039_s15, %s1373_s15   ;;  %s998_s14 = sphi %s1037_s14, %s1372_s14   ;;  %s994_s13 = sphi %s1035_s13, %s1371_s13   ;;  %s990_s12 = sphi %s1033_s12, %s1370_s12  }
   0x9   : > { %p44_p0 = scmp.ne.s32.totalorder %s994_s13, %s990_s12  ;;  %p1355_p1 = scmp.eq.s32.totalorder %s1054_s16, 0 }
   0xa   : > { %p95_p3 = scmp.eq.s32.totalorder %s618_s17, 3  ;;  %p619_p5 = scmp.ge.s32.totalorder %s1002_s15, 1 }
   0xb   : > { %p1063_p4 = por %p1355_p1, %p44_p0  ;;  %p128_p7 = scmp.lt.s32.totalorder %s1002_s15, 5 }
   0xc   : > { %p1068_p6 = por %p95_p3, %p44_p0  ;;  %s1004_s21 = smov [#allocation5]  }
   0xd   : > { %s1358_s18 = scalar_select %p1063_p4, 1, 0 }
   0xe   : > { %s1359_s19 = scalar_select %p1068_p6, 1, 0 }
   0xf   : > { %p1073_p8 = pnand %p619_p5, %p128_p7  ;;  %s140_s22 = sshll.u32 %s1004_s21, 4  ;;  %s141_s22 = int_to_ptr.vmem [resolvable:$true] %s140_s22 }
  0x10   : > { %s1086_s24 = sadd.s32 1, %s1002_s15   ;;  %s31_s25 = sadd.s32 1, %s998_s14 }
  0x11   : > { %s1360_s20 = scalar_select %p1073_p8, 1, 0 }
  0x12   : > { %p785_p9 = pneg %p1073_p8  ;;  %s28_s26 = ssub.s32 %s1002_s15, %s1086_s24 }
  0x13   : > { %s842_s29 = scalar_lea.hbm %s1352_s1, 2048 }
  0x14   : > { %p1081_p10 = pnand %p785_p9, %p1355_p1  ;;  %p843_p11 = scmp.ne.s32.totalorder %s1352_s1, %s842_s29 }
  0x15   : > { %p849_p3 = scmp.lt.u32.totalorder %s842_s29, %s1352_s1 }
  0x16   : > { %p844_p12 = pneg %p1081_p10 }
  0x18   : > { %p845_p13 = pnand %p844_p12, %p843_p11 }
  0x1a   : > { %p846_p0 = pneg %p845_p13 }
  0x1c   : > { %p851_p5 = pnand %p849_p3, %p846_p0 }
  0x1e   : > { %854 = shalt.err (!%p851_p5)
}
  0x1f   : > { %s855_s7 = scalar_lea.vmem %s141_s22, 2048  ;;  %p863_p2 = scmp.lt.s32.totalorder %s141_s22, %s141_s22 }
  0x20   : > { %p856_p7 = scmp.ne.s32.totalorder %s141_s22, %s855_s7  ;;  %p864_p6 = scmp.lt.s32.totalorder %s855_s7, %s855_s7 }
  0x22   : > { %p858_p9 = pnand %p856_p7, %p844_p12  ;;  %p865_p4 = por %p864_p6, %p863_p2 }
  0x24   : > { %p859_p1 = pneg %p858_p9 }
  0x26   : > { %p866_p8 = pnand %p865_p4, %p859_p1 }
  0x28   : > { %869 = shalt.err (!%p866_p8)
}
  0x29   : > { %s1005_s8 = smov 128   ;;  %s1006_s9 = smov 8  }
  0x2a   : > { %788 = dma.hbm_to_vmem [thread:$0]  (!%p1081_p10), %s1352_s1, 2048, %s141_s22, [#allocation6], %s1005_s8, %s1005_s8, %s1006_s9  }
  0x2b   : > { %p29_p1 = scmp.eq.s32.totalorder %s28_s26, 0  ;;  %p38_p2 = scmp.ne.s32.totalorder %s998_s14, %s994_s13 }
  0x2c   : > { %p39_p4 = scmp.eq.s32.totalorder %s1002_s15, 0  ;;  %p801_p6 = scmp.lt.s32.totalorder %s1002_s15, 4 }
  0x2d   : > { %s1115_s17 = scalar_select %p29_p1, %s998_s14, %s31_s25  }
  0x2e   : > { %p40_p8 = por %p39_p4, %p38_p2  ;;  %p1362_p11 = scmp.eq.s32.totalorder %s1054_s16, 3 }
  0x2f   : > { %s154_s23 = sand.u32 1, %s998_s14   ;;  %s637_s27 = sshll.u32 %s1002_s15, 11 }
  0x30   : > { %p1119_p12 = por %p1362_p11, %p38_p2  ;;  %s622_s28 = sshll.u32 %s154_s23, 7 }
  0x31   : > { %s1128_s4 = scalar_lea.hbm %s1351_s0, %s637_s27  ;;  %s158_s22 = scalar_lea.vmem [#allocation2], %s622_s28 }
  0x32   : > { %s165_s25 = sshll.u32 %s158_s22, 4  ;;  %p1130_p10 = pnand %p801_p6, %p40_p8  ;;  %s1134_s25 = int_to_ptr.vmem [resolvable:$true] %s165_s25 }
  0x33   : > { %s1136_s5 = scalar_lea.sflag [#allocation3], %s154_s23  ;;  %s870_s6 = scalar_lea.hbm %s1128_s4, 2048 }
  0x34   : > { %p871_p13 = scmp.ne.s32.totalorder %s1128_s4, %s870_s6  ;;  %p872_p0 = pneg %p1130_p10 }
  0x35   : > { %s875_s11 = scalar_lea.hbm %s1351_s0, 8192  ;;  %p876_p7 = scmp.lt.u32.totalorder %s1128_s4, %s1351_s0 }
  0x36   : > { %p873_p3 = pnand %p872_p0, %p871_p13  ;;  %p877_p9 = scmp.lt.u32.totalorder %s875_s11, %s870_s6 }
  0x37   : > { %p879_p2 = scmp.lt.u32.totalorder %s870_s6, %s1128_s4 }
  0x38   : > { %p874_p5 = pneg %p873_p3  ;;  %p878_p1 = por %p877_p9, %p876_p7 }
  0x3a   : > { %p880_p4 = por %p879_p2, %p878_p1 }
  0x3c   : > { %p881_p6 = pnand %p880_p4, %p874_p5 }
  0x3e   : > { %884 = shalt.err (!%p881_p6)
}
  0x3f   : > { %s885_s23 = scalar_lea.vmem %s1134_s25, 2048  ;;  %s1007_s29 = smov [#allocation2]  }
  0x40   : > { %p886_p8 = scmp.ne.s32.totalorder %s1134_s25, %s885_s23  ;;  %s890_s30 = sshll.u32 %s1007_s29, 4  ;;  %s891_s30 = int_to_ptr.vmem [resolvable:$false] %s890_s30 }
  0x41   : > { %s892_s22 = scalar_lea.vmem %s891_s30, 4096  ;;  %p893_p3 = scmp.lt.s32.totalorder %s1134_s25, %s891_s30 }
  0x42   : > { %p888_p11 = pnand %p886_p8, %p872_p0  ;;  %p894_p7 = scmp.lt.s32.totalorder %s892_s22, %s885_s23 }
  0x44   : > { %p889_p13 = pneg %p888_p11  ;;  %p895_p9 = por %p894_p7, %p893_p3 }
  0x46   : > { %p896_p1 = pnand %p895_p9, %p889_p13 }
  0x48   : > { %899 = shalt.err (!%p896_p1)
}
  0x49   : > { %792 = dma.hbm_to_vmem [thread:$0]  (!%p1130_p10), %s1128_s4, 2048, %s1134_s25, %s1136_s5, %s1005_s8, %s1005_s8, %s1006_s9  }
  0x4a   : > { %p1365_p0 = scmp.ne.s32.totalorder %s1360_s20, 0 }
  0x4b   : > { %s1170_s6 = sand.u32 (!%p1365_p0), 1, %s994_s13   ;;  %p1366_p5 = scmp.ne.s32.totalorder (!%p1365_p0), %s1358_s18, 0 }
  0x4c   : > { %177 = sbr.rel (%p1365_p0) target bundleno = 406 (0x196), region = 28  ;;  %s626_s7 = sshll.u32 (!%p1365_p0), %s1170_s6, 7 }
  0x4d   : > { %s180_s10 = scalar_lea.sflag (!%p1365_p0), [#allocation3], %s1170_s6  ;;  %s1176_s26 = scalar_lea.vmem (!%p1365_p0), [#allocation2], %s626_s7 }
  0x53   : > { %973 = dma.done.wait (%p1366_p5), %s180_s10, 2048  }
  0x54   : > { %975 = vsyncadd (%p1366_p5), %s180_s10, 4294965248  ;;  %p1367_p10 = scmp.eq.s32.totalorder %s1054_s16, 0 }
  0x56   : > { %977 = dma.done.wait (%p1367_p10), [#allocation6], 2048   ;;  %p1368_p2 = pmov %p1367_p10 }
  0x57   : > { %v233_v0 = vld [vmem:[#allocation5] sm:$0xff]  ;;  %v234_v1 = vld [vmem:[#allocation5 + $0x8] sm:$0xff]  ;;  %v235_v2 = vld [vmem:[#allocation5 + $0x10] sm:$0xff]  ;;  %s629_s18 = sshll.u32 %s1170_s6, 3  ;;  %v1008_v40 = vmov 0.0   ;;  %s1210_s8 = scalar_lea.vmem [#allocation7], %s626_s7 }
  0x58   : > { %979 = vsyncadd (%p1368_p2), [#allocation6], 4294965248  ;;  %v727_v3 = vpack.c.bf16 %v234_v1, %v233_v0  ;;  %v236_v4 = vld [vmem:[#allocation5 + $0x18] sm:$0xff]  ;;  %v237_v6 = vld [vmem:[#allocation5 + $0x20] sm:$0xff]  ;;  %s1203_s20 = scalar_lea.vmem [#allocation8], %s629_s18  ;;  %s638_s9 = sshll.u32 %s1054_s16, 11 }
  0x59   : > { %v731_v5 = vpack.c.bf16 %v236_v4, %v235_v2  ;;  %v238_v7 = vld [vmem:[#allocation5 + $0x28] sm:$0xff]  ;;  %v217_v9 = vld [vmem:[%s1176_s26] sm:$0xff]  ;;  %v239_v10 = vld [vmem:[#allocation5 + $0x30] sm:$0xff]  ;;  %470 = vst [vmem:[%s1203_s20 + $0x2] sm:$0x3f] %v1008_v40  ;;  %s490_s4 = sshll.u32 %s1210_s8, 4  ;;  %s1245_s11 = scalar_lea.hbm %s1353_s2, %s638_s9  ;;  %s1247_s4 = int_to_ptr.vmem [resolvable:$true] %s490_s4 }
  0x5a   : > { %728 = vmatprep.subr.bf16.mxu0 %v727_v3  ;;  %759 = vmatprep.subr.bf16.mxu1 %v727_v3  ;;  %v735_v8 = vpack.c.bf16 %v238_v7, %v237_v6  ;;  %v240_v11 = vld [vmem:[#allocation5 + $0x38] sm:$0xff]  ;;  %v225_v12 = vld [vmem:[%s1176_s26 + $0x40] sm:$0xff]  ;;  %v242_v15 = vld [vmem:[#allocation5 + $0x48] sm:$0xff]  ;;  %s472_s27 = scalar_lea.sflag [#allocation4], %s1170_s6  ;;  %s900_s28 = scalar_lea.vmem %s1247_s4, 2048 }
  0x5b   : > { %730 = vmatpush3.bf16.msra.mxu0 %v727_v3  ;;  %767 = vmatpush3.bf16.msra.mxu1 %v727_v3  ;;  %v739_v13 = vpack.c.bf16 %v240_v11, %v239_v10  ;;  %v241_v14 = vld [vmem:[#allocation5 + $0x40] sm:$0xff]  ;;  %v243_v17 = vld [vmem:[#allocation5 + $0x50] sm:$0xff]  ;;  %v244_v18 = vld [vmem:[#allocation5 + $0x58] sm:$0xff]  ;;  %p901_p4 = scmp.ne.s32.totalorder %s1247_s4, %s900_s28  ;;  %s1009_s23 = smov [#allocation7]  }
  0x5c   : > { %732 = vmatprep.subr.bf16.mxu0 %v731_v5  ;;  %760 = vmatprep.subr.bf16.mxu1 %v731_v5  ;;  %v743_v16 = vpack.c.bf16 %v242_v15, %v241_v14  ;;  %v747_v19 = vpack.c.bf16 %v244_v18, %v243_v17  ;;  %v245_v20 = vld [vmem:[#allocation5 + $0x60] sm:$0xff]  ;;  %v246_v21 = vld [vmem:[#allocation5 + $0x68] sm:$0xff]  ;;  %v247_v23 = vld [vmem:[#allocation5 + $0x70] sm:$0xff]  ;;  %s904_s29 = sshll.u32 %s1009_s23, 4  ;;  %s905_s29 = int_to_ptr.vmem [resolvable:$false] %s904_s29 }
  0x5d   : > { %703 = vmatprep.mubr.f32.mxu0 %v217_v9  ;;  %715 = vmatprep.mubr.f32.mxu1 %v225_v12  ;;  %v751_v22 = vpack.c.bf16 %v246_v21, %v245_v20  ;;  %v248_v24 = vld [vmem:[#allocation5 + $0x78] sm:$0xff]  ;;  %v218_v26 = vld [vmem:[%s1176_s26 + $0x8] sm:$0xff]  ;;  %v219_v28 = vld [vmem:[%s1176_s26 + $0x10] sm:$0xff]  ;;  %p902_p6 = pnand %p901_p4, %p1119_p12  ;;  %s906_s30 = scalar_lea.vmem %s905_s29, 4096 }
  0x5e   : > { %v755_v25 = vpack.c.bf16 %v248_v24, %v247_v23  ;;  %v226_v27 = vld [vmem:[%s1176_s26 + $0x48] sm:$0xff]  ;;  %v227_v29 = vld [vmem:[%s1176_s26 + $0x50] sm:$0xff]  ;;  %v220_v30 = vld [vmem:[%s1176_s26 + $0x18] sm:$0xff]  ;;  %p907_p11 = scmp.lt.s32.totalorder %s1247_s4, %s905_s29  ;;  %p908_p13 = scmp.lt.s32.totalorder %s906_s30, %s900_s28 }
  0x5f   : > { %734 = vmatpush3.bf16.msra.mxu0 %v731_v5  ;;  %768 = vmatpush3.bf16.msra.mxu1 %v731_v5  ;;  %v228_v31 = vld [vmem:[%s1176_s26 + $0x58] sm:$0xff]  ;;  %v221_v32 = vld [vmem:[%s1176_s26 + $0x20] sm:$0xff]  ;;  %v222_v34 = vld [vmem:[%s1176_s26 + $0x28] sm:$0xff]  ;;  %p903_p8 = pneg %p902_p6 }
  0x60   : > { %736 = vmatprep.subr.bf16.mxu0 %v735_v8  ;;  %761 = vmatprep.subr.bf16.mxu1 %v735_v8  ;;  %v229_v33 = vld [vmem:[%s1176_s26 + $0x60] sm:$0xff]  ;;  %v230_v35 = vld [vmem:[%s1176_s26 + $0x68] sm:$0xff]  ;;  %v223_v36 = vld [vmem:[%s1176_s26 + $0x30] sm:$0xff]  ;;  %p909_p3 = por %p908_p13, %p907_p11 }
  0x61   : > { %v231_v37 = vld [vmem:[%s1176_s26 + $0x70] sm:$0xff]  ;;  %v224_v38 = vld [vmem:[%s1176_s26 + $0x38] sm:$0xff] }
  0x62   : > { %v232_v39 = vld [vmem:[%s1176_s26 + $0x78] sm:$0xff]  ;;  %p910_p7 = pnand %p909_p3, %p903_p8 }
  0x63   : > { %738 = vmatpush3.bf16.msra.mxu0 %v735_v8  ;;  %769 = vmatpush3.bf16.msra.mxu1 %v735_v8 }
  0x64   : > { %740 = vmatprep.subr.bf16.mxu0 %v739_v13  ;;  %762 = vmatprep.subr.bf16.mxu1 %v739_v13 }
  0x67   : > { %742 = vmatpush3.bf16.msra.mxu0 %v739_v13  ;;  %770 = vmatpush3.bf16.msra.mxu1 %v739_v13 }
  0x68   : > { %744 = vmatprep.subr.bf16.mxu0 %v743_v16  ;;  %763 = vmatprep.subr.bf16.mxu1 %v743_v16 }
  0x6b   : > { %746 = vmatpush3.bf16.msra.mxu0 %v743_v16  ;;  %771 = vmatpush3.bf16.msra.mxu1 %v743_v16 }
  0x6c   : > { %748 = vmatprep.subr.bf16.mxu0 %v747_v19  ;;  %764 = vmatprep.subr.bf16.mxu1 %v747_v19 }
  0x6f   : > { %750 = vmatpush3.bf16.msra.mxu0 %v747_v19  ;;  %772 = vmatpush3.bf16.msra.mxu1 %v747_v19 }
  0x70   : > { %752 = vmatprep.subr.bf16.mxu0 %v751_v22  ;;  %765 = vmatprep.subr.bf16.mxu1 %v751_v22 }
  0x73   : > { %754 = vmatpush3.bf16.msra.mxu0 %v751_v22  ;;  %773 = vmatpush3.bf16.msra.mxu1 %v751_v22 }
  0x74   : > { %756 = vmatprep.subr.bf16.mxu0 %v755_v25  ;;  %766 = vmatprep.subr.bf16.mxu1 %v755_v25 }
  0x77   : > { %758 = vmatpush3.bf16.msra.mxu0 %v755_v25  ;;  %774 = vmatpush3.bf16.msra.mxu1 %v755_v25 }
  0x7a   : > { %704 = vmatmul.mubr.f32.vlgmr.msra.gmra.mrb[0].mxu0 %v218_v26  ;;  %716 = vmatmul.mubr.f32.vlgmr.msra.gmra.mrb[0].mxu1 %v226_v27 }
  0x7b   : > { %706 = vmatprep.mubr.f32.mxu0 %v219_v28  ;;  %718 = vmatprep.mubr.f32.mxu1 %v227_v29 }
  0x7e   : > { %707 = vmatmul.mubr.f32.gmra.mrb[2].mxu0 %v220_v30  ;;  %719 = vmatmul.mubr.f32.gmra.mrb[2].mxu1 %v228_v31 }
  0x7f   : > { %709 = vmatprep.mubr.f32.mxu0 %v221_v32  ;;  %721 = vmatprep.mubr.f32.mxu1 %v229_v33 }
  0x82   : > { %710 = vmatmul.mubr.f32.gmra.mrb[4].mxu0 %v222_v34  ;;  %722 = vmatmul.mubr.f32.gmra.mrb[4].mxu1 %v230_v35 }
  0x83   : > { %712 = vmatprep.mubr.f32.mxu0 %v223_v36  ;;  %724 = vmatprep.mubr.f32.mxu1 %v231_v37 }
  0x86   : > { %713 = vmatmul.mubr.f32.gmra.mrb[6].mxu0 %v224_v38  ;;  %725 = vmatmul.mubr.f32.gmra.mrb[6].mxu1 %v232_v39 }
 0x14d   : > { %v705_v41 = vpop.f32.mrb[0].mxu0  ;;  %v1206_v42 = vpop.f32.mrb[0].mxu1 }
 0x14e   : > { %395 = vst [vmem:[%s1210_s8 + $0x8] sm:$0xff] %v705_v41  ;;  %v432_v43 = vmul.f32 %v705_v41, %v705_v41  ;;  %v315_v44 = vpop.f32.mrb[1].mxu0  ;;  %403 = vst [vmem:[%s1210_s8 + $0x48] sm:$0xff] %v1206_v42  ;;  %v1215_v45 = vpop.f32.mrb[1].mxu1 }
 0x14f   : > { %394 = vst [vmem:[%s1210_s8] sm:$0xff] %v315_v44  ;;  %v410_v46 = vadd.f32 %v705_v41, %v315_v44  ;;  %v431_v47 = vmul.f32 %v315_v44, %v315_v44  ;;  %402 = vst [vmem:[%s1210_s8 + $0x40] sm:$0xff] %v1215_v45 }
 0x151   : > { %v447_v48 = vadd.f32 %v432_v43, %v431_v47  ;;  %v708_v49 = vpop.f32.mrb[2].mxu0  ;;  %v1220_v50 = vpop.f32.mrb[2].mxu1 }
 0x152   : > { %397 = vst [vmem:[%s1210_s8 + $0x18] sm:$0xff] %v708_v49  ;;  %v325_v51 = vpop.f32.mrb[3].mxu0  ;;  %405 = vst [vmem:[%s1210_s8 + $0x58] sm:$0xff] %v1220_v50  ;;  %v1225_v52 = vpop.f32.mrb[3].mxu1  ;;  %v434_v55 = vmul.f32 %v708_v49, %v708_v49 }
 0x153   : > { %396 = vst [vmem:[%s1210_s8 + $0x10] sm:$0xff] %v325_v51  ;;  %v411_v53 = vadd.f32 %v410_v46, %v325_v51  ;;  %v433_v54 = vmul.f32 %v325_v51, %v325_v51  ;;  %404 = vst [vmem:[%s1210_s8 + $0x50] sm:$0xff] %v1225_v52 }
 0x155   : > { %v448_v56 = vadd.f32 %v447_v48, %v433_v54  ;;  %v711_v57 = vpop.f32.mrb[4].mxu0  ;;  %v412_v58 = vadd.f32 %v708_v49, %v411_v53  ;;  %v1230_v59 = vpop.f32.mrb[4].mxu1 }
 0x156   : > { %399 = vst [vmem:[%s1210_s8 + $0x28] sm:$0xff] %v711_v57  ;;  %v335_v60 = vpop.f32.mrb[5].mxu0  ;;  %407 = vst [vmem:[%s1210_s8 + $0x68] sm:$0xff] %v1230_v59  ;;  %v1237_v61 = vpop.f32.mrb[5].mxu1  ;;  %v436_v1 = vmul.f32 %v711_v57, %v711_v57 }
 0x157   : > { %398 = vst [vmem:[%s1210_s8 + $0x20] sm:$0xff] %v335_v60  ;;  %v413_v62 = vadd.f32 %v412_v58, %v335_v60  ;;  %v435_v63 = vmul.f32 %v335_v60, %v335_v60  ;;  %v449_v0 = vadd.f32 %v448_v56, %v434_v55  ;;  %406 = vst [vmem:[%s1210_s8 + $0x60] sm:$0xff] %v1237_v61 }
 0x159   : > { %v450_v2 = vadd.f32 %v449_v0, %v435_v63  ;;  %v714_v3 = vpop.f32.mrb[6].mxu0  ;;  %v414_v4 = vadd.f32 %v711_v57, %v413_v62  ;;  %v1249_v5 = vpop.f32.mrb[6].mxu1 }
 0x15a   : > { %401 = vst [vmem:[%s1210_s8 + $0x38] sm:$0xff] %v714_v3  ;;  %v345_v6 = vpop.f32.mrb[7].mxu0  ;;  %409 = vst [vmem:[%s1210_s8 + $0x78] sm:$0xff] %v1249_v5  ;;  %v385_v7 = vpop.f32.mrb[7].mxu1 }
 0x15b   : > { %400 = vst [vmem:[%s1210_s8 + $0x30] sm:$0xff] %v345_v6  ;;  %v415_v8 = vadd.f32 %v414_v4, %v345_v6  ;;  %v437_v9 = vmul.f32 %v345_v6, %v345_v6  ;;  %v451_v10 = vadd.f32 %v450_v2, %v436_v1  ;;  %408 = vst [vmem:[%s1210_s8 + $0x70] sm:$0xff] %v385_v7 }
 0x15c   : > { %913 = shalt.err (!%p910_p7)
}
 0x15d   : > { %s914_s22 = scalar_lea.hbm %s1245_s11, 2048  ;;  %s918_s26 = scalar_lea.hbm %s1353_s2, 8192 }
 0x15e   : > { %p915_p9 = scmp.ne.s32.totalorder %s1245_s11, %s914_s22  ;;  %p919_p5 = scmp.lt.u32.totalorder %s1245_s11, %s1353_s2 }
 0x15f   : > { %p920_p10 = scmp.lt.u32.totalorder %s918_s26, %s914_s22  ;;  %p922_p4 = scmp.lt.u32.totalorder %s914_s22, %s1245_s11 }
 0x160   : > { %p916_p1 = pnand %p915_p9, %p1119_p12 }
 0x161   : > { %p921_p2 = por %p920_p10, %p919_p5 }
 0x162   : > { %p917_p0 = pneg %p916_p1 }
 0x163   : > { %p923_p6 = por %p922_p4, %p921_p2 }
 0x165   : > { %p924_p8 = pnand %p923_p6, %p917_p0 }
 0x167   : > { %927 = shalt.err (!%p924_p8)
}
 0x168   : > { %s1010_s9 = smov 128   ;;  %s1011_s25 = smov 8   ;;  %v438_v11 = vmul.f32 %v714_v3, %v714_v3  ;;  %v416_v12 = vadd.f32 %v714_v3, %v415_v8  ;;  %v452_v13 = vadd.f32 %v451_v10, %v437_v9  ;;  %v439_v14 = vmul.f32 %v1215_v45, %v1215_v45 }
 0x169   : > { %781 = dma.vmem_to_hbm [thread:$0]  (%p1119_p12), %s1247_s4, 2048, %s1245_s11, %s472_s27, %s1010_s9, %s1010_s9, %s1011_s25   ;;  %v440_v17 = vmul.f32 %v1206_v42, %v1206_v42  ;;  %v441_v20 = vmul.f32 %v1225_v52, %v1225_v52  ;;  %v442_v23 = vmul.f32 %v1220_v50, %v1220_v50  ;;  %v443_v26 = vmul.f32 %v1237_v61, %v1237_v61 }
 0x16a   : > { %v453_v15 = vadd.f32 %v452_v13, %v438_v11  ;;  %v417_v16 = vadd.f32 %v416_v12, %v1215_v45  ;;  %v444_v29 = vmul.f32 %v1230_v59, %v1230_v59  ;;  %v445_v32 = vmul.f32 %v385_v7, %v385_v7  ;;  %s634_s4 = sshll.u32 %s1054_s16, 7  ;;  %s506_s5 = sshll.u32 %s1203_s20, 4  ;;  %s1309_s5 = int_to_ptr.vmem [resolvable:$true] %s506_s5 }
 0x16b   : > { %v446_v35 = vmul.f32 %v1249_v5, %v1249_v5  ;;  %s1307_s28 = scalar_lea.hbm %s1354_s3, %s634_s4  ;;  %s477_s23 = scalar_lea.sflag [#allocation9], %s1170_s6 }
 0x16c   : > { %v454_v18 = vadd.f32 %v453_v15, %v439_v14  ;;  %v418_v19 = vadd.f32 %v1206_v42, %v417_v16  ;;  %s928_s29 = scalar_lea.vmem %s1309_s5, 128  ;;  %s1012_s16 = smov [#allocation8]  }
 0x16d   : > { %p929_p11 = scmp.ne.s32.totalorder %s1309_s5, %s928_s29  ;;  %s932_s30 = sshll.u32 %s1012_s16, 4  ;;  %s933_s30 = int_to_ptr.vmem [resolvable:$false] %s932_s30 }
 0x16e   : > { %v419_v21 = vadd.f32 %v418_v19, %v1225_v52  ;;  %v455_v22 = vadd.f32 %v454_v18, %v440_v17  ;;  %s934_s22 = scalar_lea.vmem %s933_s30, 256  ;;  %p935_p7 = scmp.lt.s32.totalorder %s1309_s5, %s933_s30 }
 0x16f   : > { %p930_p13 = pnand %p929_p11, %p1119_p12  ;;  %p936_p9 = scmp.lt.s32.totalorder %s934_s22, %s928_s29 }
 0x170   : > { %v456_v24 = vadd.f32 %v455_v22, %v441_v20  ;;  %v420_v25 = vadd.f32 %v1220_v50, %v419_v21 }
 0x171   : > { %p931_p3 = pneg %p930_p13  ;;  %p937_p1 = por %p936_p9, %p935_p7 }
 0x172   : > { %v421_v27 = vadd.f32 %v420_v25, %v1237_v61  ;;  %v457_v28 = vadd.f32 %v456_v24, %v442_v23 }
 0x173   : > { %p938_p0 = pnand %p937_p1, %p931_p3 }
 0x174   : > { %v458_v30 = vadd.f32 %v457_v28, %v443_v26  ;;  %v422_v31 = vadd.f32 %v1230_v59, %v421_v27 }
 0x176   : > { %v423_v33 = vadd.f32 %v422_v31, %v385_v7  ;;  %v459_v34 = vadd.f32 %v458_v30, %v444_v29 }
 0x178   : > { %v424_v36 = vadd.f32 %v1249_v5, %v423_v33  ;;  %v460_v37 = vadd.f32 %v459_v34, %v445_v32 }
 0x17a   : > { %v425_v38 = vrot.slane %v424_v36, 4  ;;  %v461_v39 = vadd.f32 %v460_v37, %v446_v35 }
 0x17c   : > { %v426_v40 = vadd.f32 %v425_v38, %v424_v36  ;;  %v462_v41 = vrot.slane %v461_v39, 4 }
 0x17e   : > { %v427_v42 = vrot.slane %v426_v40, 2  ;;  %v463_v43 = vadd.f32 %v462_v41, %v461_v39 }
 0x180   : > { %v428_v44 = vadd.f32 %v427_v42, %v426_v40  ;;  %v464_v45 = vrot.slane %v463_v43, 2 }
 0x182   : > { %v429_v46 = vrot.slane %v428_v44, 1  ;;  %v465_v47 = vadd.f32 %v464_v45, %v463_v43 }
 0x184   : > { %v430_v48 = vadd.f32 %v429_v46, %v428_v44  ;;  %v466_v49 = vrot.slane %v465_v47, 1 }
 0x186   : > { %v467_v50 = vadd.f32 %v466_v49, %v465_v47  ;;  %468 = vst [vmem:[%s1203_s20] sm:$0x1] %v430_v48 }
 0x188   : > { %469 = vst [vmem:[%s1203_s20 + $0x1] sm:$0x1] %v467_v50 }
 0x189   : > { %941 = shalt.err (!%p938_p0)
}
 0x18a   : > { %s942_s6 = scalar_lea.hbm %s1307_s28, 128  ;;  %s946_s10 = scalar_lea.hbm %s1354_s3, 512 }
 0x18b   : > { %p943_p5 = scmp.ne.s32.totalorder %s1307_s28, %s942_s6  ;;  %p947_p4 = scmp.lt.u32.totalorder %s1307_s28, %s1354_s3 }
 0x18c   : > { %p948_p6 = scmp.lt.u32.totalorder %s946_s10, %s942_s6  ;;  %p950_p11 = scmp.lt.u32.totalorder %s942_s6, %s1307_s28 }
 0x18d   : > { %p944_p10 = pnand %p943_p5, %p1119_p12 }
 0x18e   : > { %p949_p8 = por %p948_p6, %p947_p4 }
 0x18f   : > { %p945_p2 = pneg %p944_p10 }
 0x190   : > { %p951_p13 = por %p950_p11, %p949_p8 }
 0x192   : > { %p952_p3 = pnand %p951_p13, %p945_p2 }
 0x194   : > { %955 = shalt.err (!%p952_p3)
}
 0x195   : > { %782 = dma.vmem_to_hbm [thread:$0]  (%p1119_p12), %s1309_s5, 128, %s1307_s28, %s477_s23  }
 0x196 PF: > { %p803_p7 = scmp.ge.s32.totalorder %s1002_s15, 2  ;;  %s518_s8 = sand.u32 1, %s990_s12  }
 0x197   : > { %p1369_p9 = scmp.ne.s32.totalorder %s1359_s19, 0  ;;  %s519_s9 = scalar_lea.sflag [#allocation4], %s518_s8 }
 0x199   : > { %p794_p1 = pnand %p803_p7, %p1369_p9 }
 0x19b   : > { %981 = dma.done.wait (!%p794_p1), %s519_s9, 2048  }
 0x19c   : > { %983 = vsyncadd (!%p794_p1), %s519_s9, 4294965248  ;;  %s528_s25 = scalar_lea.sflag [#allocation9], %s518_s8 }
 0x19d   : > { %985 = dma.done.wait (!%p794_p1), %s528_s25, 128  }
 0x19e   : > { %987 = vsyncadd (!%p794_p1), %s528_s25, 4294967168  ;;  %p21_p12 = scmp.ge.s32.totalorder %s1086_s24, 6   ;;  %s1370_s12 = smov %s994_s13 }
 0x19f   : > { %s1371_s13 = smov %s998_s14  ;;  %s1372_s14 = smov %s1115_s17 }
 0x1a0   : > { %s1373_s15 = smov %s1086_s24  ;;  %23 = sbr.rel (!%p21_p12) target bundleno = 8 (0x8), region = 94 }
 0x1a7   :  { %533 = vsyncpa [#allocation3], 1 }
 0x1a8   :  { %535 = vsyncpa [#allocation3 + $0x1], 1 }
 0x1a9   :  { %536 = vsyncpa [#allocation6], 1 }
 0x1aa   :  { %537 = vsyncpa [#allocation4], 1 }
 0x1ab   :  { %539 = vsyncpa [#allocation4 + $0x1], 1 }
 0x1ac   :  { %540 = vsyncpa [#allocation9], 1 }
 0x1ad   :  { %542 = vsyncpa [#allocation9 + $0x1], 1 }

</bundles_post_ra>
